<compile_context>
chip_gen: v7x
topology: tpu7x:2x2x1
jax: 0.10.0
libtpu: 0.0.40
codegen_flags: <defaults>
</compile_context>

<pallas_src>
import functools

import jax
import jax.numpy as jnp
from jax.experimental import pallas as pl
from jax.experimental.pallas import tpu as pltpu


# --------------------------------------------------------------------------- #
# Fused kernel: 4x (RelGraphConv + tanh) -> concat -> gather -> MLP head
# --------------------------------------------------------------------------- #
def _igmc_fused_kernel(*refs, num_layers, num_rels, multiply_by):
    # refs: x, adj_flat, usel, isel,
    #       [w_stack_l, w_loop_l, bias_l] * num_layers,
    #       w1, b1, w2, b2, out
    x_ref, adjf_ref, usel_ref, isel_ref = refs[:4]
    layer_refs = refs[4:4 + 3 * num_layers]
    w1_ref, b1_ref, w2_ref, b2_ref, out_ref = refs[4 + 3 * num_layers:]

    n = x_ref.shape[0]
    # Adjacency: stored bf16 in HBM (exact for small integer edge counts),
    # cast to f32 once and reused by all layers (stays resident in VMEM).
    a = adjf_ref[...].astype(jnp.float32)                  # (N, R*N)
    h = x_ref[...].astype(jnp.float32)                     # (N, Din0)

    cs_parts = []
    for l in range(num_layers):
        w_stack = layer_refs[3 * l][...]                   # (Din, R*Dout)
        w_loop = layer_refs[3 * l + 1][...]                # (Din, Dout)
        bias = layer_refs[3 * l + 2][...]                  # (1, Dout)
        d_out = w_loop.shape[1]

        # Single stacked projection: xw[u, r*Dout + o] = (H @ W_r)[u, o]
        xw = jnp.dot(h, w_stack, preferred_element_type=jnp.float32)  # (N, R*Dout)
        # Rearrange to rows ordered (r, u) to match adj_flat[v, r*N + u].
        xw_rows = jnp.concatenate(
            [xw[:, r * d_out:(r + 1) * d_out] for r in range(num_rels)],
            axis=0)                                        # (R*N, Dout)
        # Single aggregation matmul over the joint (r, u) contraction.
        agg = jnp.dot(a, xw_rows, preferred_element_type=jnp.float32)  # (N, Dout)

        h = jnp.tanh(agg
                     + jnp.dot(h, w_loop, preferred_element_type=jnp.float32)
                     + bias)
        cs_parts.append(h)

    cs = jnp.concatenate(cs_parts, axis=1)                 # (N, sum(latent)) = (N, 128)

    # Gather target user / item rows via one-hot selector matmuls (exact).
    fu = jnp.dot(usel_ref[...], cs, preferred_element_type=jnp.float32)  # (P, 128)
    fi = jnp.dot(isel_ref[...], cs, preferred_element_type=jnp.float32)  # (P, 128)
    feat = jnp.concatenate([fu, fi], axis=1)               # (P, 256)

    # Regression head: relu(feat @ W1 + b1) @ W2 + b2; dropout is identity in
    # eval mode.
    hid = jnp.maximum(
        jnp.dot(feat, w1_ref[...], preferred_element_type=jnp.float32)
        + b1_ref[...], 0.0)
    y = jnp.dot(hid, w2_ref[...], preferred_element_type=jnp.float32) + b2_ref[...]
    out_ref[...] = y * multiply_by


def igmc_forward(params, x, adj, user_idx, item_idx, multiply_by=1.0):
    """Eval-mode IGMC forward.  adj: (R, N, N) dense per-relation edge masks."""
    n = x.shape[0]
    num_rels = adj.shape[0]
    p = user_idx.shape[0]
    num_layers = len(params["convs"])

    # Wrapper-side (cheap, done once, shared across all 4 layers):
    #   adj_flat[v, r*N + u] = adj[r, v, u], stored bf16 (exact small ints)
    adj_flat = (jnp.transpose(adj, (1, 0, 2))
                .reshape(n, num_rels * n)
                .astype(jnp.bfloat16))
    usel = jax.nn.one_hot(user_idx, n, dtype=jnp.float32)  # (P, N)
    isel = jax.nn.one_hot(item_idx, n, dtype=jnp.float32)  # (P, N)

    layer_args = []
    for conv in params["convs"]:
        # Basis decomposition combined ONCE here: W_r = sum_b w_comp[r,b]*basis[b]
        w_all = jnp.einsum("rb,bio->rio", conv["w_comp"], conv["basis"])
        d_in, d_out = conv["w_loop"].shape
        w_stack = jnp.transpose(w_all, (1, 0, 2)).reshape(d_in, num_rels * d_out)
        layer_args += [w_stack, conv["w_loop"], conv["bias"].reshape(1, d_out)]

    inputs = [x.astype(jnp.float32), adj_flat, usel, isel, *layer_args,
              params["lin1_w"], params["lin1_b"].reshape(1, -1),
              params["lin2_w"], params["lin2_b"].reshape(1, 1)]

    in_specs = [pl.BlockSpec(a.shape, lambda i: (0, 0)) for a in inputs]

    kernel = functools.partial(_igmc_fused_kernel,
                               num_layers=num_layers,
                               num_rels=num_rels,
                               multiply_by=float(multiply_by))
    y = pl.pallas_call(
        kernel,
        out_shape=jax.ShapeDtypeStruct((p, 1), jnp.float32),
        grid=(1,),
        in_specs=in_specs,
        out_specs=pl.BlockSpec((p, 1), lambda i: (0, 0)),
        compiler_params=pltpu.CompilerParams(
            dimension_semantics=("arbitrary",)),
    )(*inputs)
    return y[:, 0]                                         # matches x[:, 0] * multiply_by


# --------------------------------------------------------------------------- #
# Parameter init (deterministic, synthetic)
# --------------------------------------------------------------------------- #
def init_igmc_params(key, in_feats=4, latent_dim=(32, 32, 32, 32),
                     num_relations=5, num_bases=2):
    dims = (in_feats,) + tuple(latent_dim)
    params = {"convs": []}
    for l in range(len(latent_dim)):
        key, k1, k2, k3, k4 = jax.random.split(key, 5)
        d_in, d_out = dims[l], dims[l + 1]
        s = 1.0 / jnp.sqrt(jnp.float32(d_in))
        params["convs"].append(dict(
            basis=jax.random.uniform(k1, (num_bases, d_in, d_out), jnp.float32, -s, s),
            w_comp=jax.random.uniform(k2, (num_relations, num_bases), jnp.float32, -s, s),
            w_loop=jax.random.uniform(k3, (d_in, d_out), jnp.float32, -s, s),
            bias=jax.random.uniform(k4, (d_out,), jnp.float32, -s, s),
        ))
    d_cat = 2 * sum(latent_dim)                            # 256
    key, k1, k2, k3, k4 = jax.random.split(key, 5)
    s1 = 1.0 / jnp.sqrt(jnp.float32(d_cat))
    s2 = 1.0 / jnp.sqrt(jnp.float32(128))
    params["lin1_w"] = jax.random.uniform(k1, (d_cat, 128), jnp.float32, -s1, s1)
    params["lin1_b"] = jax.random.uniform(k2, (128,), jnp.float32, -s1, s1)
    params["lin2_w"] = jax.random.uniform(k3, (128, 1), jnp.float32, -s2, s2)
    params["lin2_b"] = jax.random.uniform(k4, (1,), jnp.float32, -s2, s2)
    return params


if __name__ == "__main__":
    key = jax.random.PRNGKey(0)
    N, E = 16, 48
    in_feats, num_rels = 4, 5

    kx, ks, kd, ke, kp = jax.random.split(key, 5)

    # node features (IGMC uses one-hot-ish hop labels; any f32 features suffice)
    x = jax.random.uniform(kx, (N, in_feats), jnp.float32)

    # random edges u -> v with relation types; edge_mask == 1 (eval mode)
    src = jax.random.randint(ks, (E,), 0, N)
    dst = jax.random.randint(kd, (E,), 0, N)
    etype = jax.random.randint(ke, (E,), 0, num_rels)
    edge_mask = jnp.ones((E,), jnp.float32)

    adj = jnp.zeros((num_rels, N, N), jnp.float32)
    adj = adj.at[etype, dst, src].add(edge_mask)           # A[r, v, u] += mask

    # Target nodes: equivalent of nlabel[:,0]==1 -> nodes {0,1} (users) and
    # nlabel[:,1]==1 -> nodes {2,3} (items), expressed as fixed-size integer
    # index arrays so the whole forward is jittable.
    user_idx = jnp.array([0, 1], jnp.int32)
    item_idx = jnp.array([2, 3], jnp.int32)

    params = init_igmc_params(kp, in_feats=in_feats)

    fwd = jax.jit(functools.partial(igmc_forward, multiply_by=1.0))
    out = fwd(params, x, adj, user_idx, item_idx)
    out = jax.block_until_ready(out)
    assert out.shape == (2,) and out.dtype == jnp.float32
    print("KERNEL_OK")
</pallas_src>

<mosaic_0001>
module attributes {stable_mosaic.version = 11 : i64} {
  func.func @_igmc_fused_kernel(%arg0: i32, %arg1: memref<16x4xf32, #tpu.memory_space<vmem>>, %arg2: memref<16x80xbf16, #tpu.memory_space<vmem>>, %arg3: memref<2x16xf32, #tpu.memory_space<vmem>>, %arg4: memref<2x16xf32, #tpu.memory_space<vmem>>, %arg5: memref<4x160xf32, #tpu.memory_space<vmem>>, %arg6: memref<4x32xf32, #tpu.memory_space<vmem>>, %arg7: memref<1x32xf32, #tpu.memory_space<vmem>>, %arg8: memref<32x160xf32, #tpu.memory_space<vmem>>, %arg9: memref<32x32xf32, #tpu.memory_space<vmem>>, %arg10: memref<1x32xf32, #tpu.memory_space<vmem>>, %arg11: memref<32x160xf32, #tpu.memory_space<vmem>>, %arg12: memref<32x32xf32, #tpu.memory_space<vmem>>, %arg13: memref<1x32xf32, #tpu.memory_space<vmem>>, %arg14: memref<32x160xf32, #tpu.memory_space<vmem>>, %arg15: memref<32x32xf32, #tpu.memory_space<vmem>>, %arg16: memref<1x32xf32, #tpu.memory_space<vmem>>, %arg17: memref<256x128xf32, #tpu.memory_space<vmem>>, %arg18: memref<1x128xf32, #tpu.memory_space<vmem>>, %arg19: memref<128x1xf32, #tpu.memory_space<vmem>>, %arg20: memref<1x1xf32, #tpu.memory_space<vmem>>, %arg21: memref<2x1xf32, #tpu.memory_space<vmem>>) attributes {dimension_semantics = [#tpu.dimension_semantics<arbitrary>], iteration_bounds = array<i64: 1>, scalar_prefetch = 0 : i64, scratch_operands = 0 : i64, tpu.core_type = #tpu.core_type<tc>, window_params = [{pipeline_mode = #tpu.pipeline_mode<synchronous>, transform_indices = @transform_0, window_bounds = array<i64: 16, 4>}, {pipeline_mode = #tpu.pipeline_mode<synchronous>, transform_indices = @transform_1, window_bounds = array<i64: 16, 80>}, {pipeline_mode = #tpu.pipeline_mode<synchronous>, transform_indices = @transform_2, window_bounds = array<i64: 2, 16>}, {pipeline_mode = #tpu.pipeline_mode<synchronous>, transform_indices = @transform_3, window_bounds = array<i64: 2, 16>}, {pipeline_mode = #tpu.pipeline_mode<synchronous>, transform_indices = @transform_4, window_bounds = array<i64: 4, 160>}, {pipeline_mode = #tpu.pipeline_mode<synchronous>, transform_indices = @transform_5, window_bounds = array<i64: 4, 32>}, {pipeline_mode = #tpu.pipeline_mode<synchronous>, transform_indices = @transform_6, window_bounds = array<i64: 1, 32>}, {pipeline_mode = #tpu.pipeline_mode<synchronous>, transform_indices = @transform_7, window_bounds = array<i64: 32, 160>}, {pipeline_mode = #tpu.pipeline_mode<synchronous>, transform_indices = @transform_8, window_bounds = array<i64: 32, 32>}, {pipeline_mode = #tpu.pipeline_mode<synchronous>, transform_indices = @transform_9, window_bounds = array<i64: 1, 32>}, {pipeline_mode = #tpu.pipeline_mode<synchronous>, transform_indices = @transform_10, window_bounds = array<i64: 32, 160>}, {pipeline_mode = #tpu.pipeline_mode<synchronous>, transform_indices = @transform_11, window_bounds = array<i64: 32, 32>}, {pipeline_mode = #tpu.pipeline_mode<synchronous>, transform_indices = @transform_12, window_bounds = array<i64: 1, 32>}, {pipeline_mode = #tpu.pipeline_mode<synchronous>, transform_indices = @transform_13, window_bounds = array<i64: 32, 160>}, {pipeline_mode = #tpu.pipeline_mode<synchronous>, transform_indices = @transform_14, window_bounds = array<i64: 32, 32>}, {pipeline_mode = #tpu.pipeline_mode<synchronous>, transform_indices = @transform_15, window_bounds = array<i64: 1, 32>}, {pipeline_mode = #tpu.pipeline_mode<synchronous>, transform_indices = @transform_16, window_bounds = array<i64: 256, 128>}, {pipeline_mode = #tpu.pipeline_mode<synchronous>, transform_indices = @transform_17, window_bounds = array<i64: 1, 128>}, {pipeline_mode = #tpu.pipeline_mode<synchronous>, transform_indices = @transform_18, window_bounds = array<i64: 128, 1>}, {pipeline_mode = #tpu.pipeline_mode<synchronous>, transform_indices = @transform_19, window_bounds = array<i64: 1, 1>}, {pipeline_mode = #tpu.pipeline_mode<synchronous>, transform_indices = @transform_20, window_bounds = array<i64: 2, 1>}]} {
    %c0 = arith.constant 0 : index
    %c0_0 = arith.constant 0 : index
    %0 = vector.load %arg2[%c0, %c0_0] : memref<16x80xbf16, #tpu.memory_space<vmem>>, vector<16x80xbf16>
    %1 = arith.extf %0 : vector<16x80xbf16> to vector<16x80xf32>
    %c0_1 = arith.constant 0 : index
    %c0_2 = arith.constant 0 : index
    %2 = vector.load %arg1[%c0_1, %c0_2] : memref<16x4xf32, #tpu.memory_space<vmem>>, vector<16x4xf32>
    %c0_3 = arith.constant 0 : index
    %c0_4 = arith.constant 0 : index
    %3 = vector.load %arg5[%c0_3, %c0_4] : memref<4x160xf32, #tpu.memory_space<vmem>>, vector<4x160xf32>
    %c0_5 = arith.constant 0 : index
    %c0_6 = arith.constant 0 : index
    %4 = vector.load %arg6[%c0_5, %c0_6] : memref<4x32xf32, #tpu.memory_space<vmem>>, vector<4x32xf32>
    %c0_7 = arith.constant 0 : index
    %c0_8 = arith.constant 0 : index
    %5 = vector.load %arg7[%c0_7, %c0_8] : memref<1x32xf32, #tpu.memory_space<vmem>>, vector<1x32xf32>
    %cst = arith.constant dense<0.000000e+00> : vector<16x160xf32>
    %6 = tpu.matmul %2, %3, %cst {dimension_numbers = #tpu.dot_dimension_numbers<[1], [0], [0], [1], [0, 0, 1, 1], [], []>} : vector<16x4xf32>, vector<4x160xf32>, vector<16x160xf32> -> vector<16x160xf32>
    %7 = vector.extract_strided_slice %6 {offsets = [0, 0], sizes = [16, 32], strides = [1, 1]} : vector<16x160xf32> to vector<16x32xf32>
    %8 = vector.extract_strided_slice %6 {offsets = [0, 32], sizes = [16, 32], strides = [1, 1]} : vector<16x160xf32> to vector<16x32xf32>
    %9 = vector.extract_strided_slice %6 {offsets = [0, 64], sizes = [16, 32], strides = [1, 1]} : vector<16x160xf32> to vector<16x32xf32>
    %10 = vector.extract_strided_slice %6 {offsets = [0, 96], sizes = [16, 32], strides = [1, 1]} : vector<16x160xf32> to vector<16x32xf32>
    %11 = vector.extract_strided_slice %6 {offsets = [0, 128], sizes = [16, 32], strides = [1, 1]} : vector<16x160xf32> to vector<16x32xf32>
    %12 = tpu.concatenate %7, %8, %9, %10, %11 in 0 : vector<16x32xf32>, vector<16x32xf32>, vector<16x32xf32>, vector<16x32xf32>, vector<16x32xf32> -> vector<80x32xf32>
    %cst_9 = arith.constant dense<0.000000e+00> : vector<16x32xf32>
    %13 = tpu.matmul %1, %12, %cst_9 {dimension_numbers = #tpu.dot_dimension_numbers<[1], [0], [0], [1], [0, 0, 1, 1], [], []>} : vector<16x80xf32>, vector<80x32xf32>, vector<16x32xf32> -> vector<16x32xf32>
    %cst_10 = arith.constant dense<0.000000e+00> : vector<16x32xf32>
    %14 = tpu.matmul %2, %4, %cst_10 {dimension_numbers = #tpu.dot_dimension_numbers<[1], [0], [0], [1], [0, 0, 1, 1], [], []>} : vector<16x4xf32>, vector<4x32xf32>, vector<16x32xf32> -> vector<16x32xf32>
    %15 = arith.addf %13, %14 : vector<16x32xf32>
    %16 = vector.broadcast %5 : vector<1x32xf32> to vector<16x32xf32>
    %17 = arith.addf %15, %16 : vector<16x32xf32>
    %18 = math.tanh %17 : vector<16x32xf32>
    %c0_11 = arith.constant 0 : index
    %c0_12 = arith.constant 0 : index
    %19 = vector.load %arg8[%c0_11, %c0_12] : memref<32x160xf32, #tpu.memory_space<vmem>>, vector<32x160xf32>
    %c0_13 = arith.constant 0 : index
    %c0_14 = arith.constant 0 : index
    %20 = vector.load %arg9[%c0_13, %c0_14] : memref<32x32xf32, #tpu.memory_space<vmem>>, vector<32x32xf32>
    %c0_15 = arith.constant 0 : index
    %c0_16 = arith.constant 0 : index
    %21 = vector.load %arg10[%c0_15, %c0_16] : memref<1x32xf32, #tpu.memory_space<vmem>>, vector<1x32xf32>
    %cst_17 = arith.constant dense<0.000000e+00> : vector<16x160xf32>
    %22 = tpu.matmul %18, %19, %cst_17 {dimension_numbers = #tpu.dot_dimension_numbers<[1], [0], [0], [1], [0, 0, 1, 1], [], []>} : vector<16x32xf32>, vector<32x160xf32>, vector<16x160xf32> -> vector<16x160xf32>
    %23 = vector.extract_strided_slice %22 {offsets = [0, 0], sizes = [16, 32], strides = [1, 1]} : vector<16x160xf32> to vector<16x32xf32>
    %24 = vector.extract_strided_slice %22 {offsets = [0, 32], sizes = [16, 32], strides = [1, 1]} : vector<16x160xf32> to vector<16x32xf32>
    %25 = vector.extract_strided_slice %22 {offsets = [0, 64], sizes = [16, 32], strides = [1, 1]} : vector<16x160xf32> to vector<16x32xf32>
    %26 = vector.extract_strided_slice %22 {offsets = [0, 96], sizes = [16, 32], strides = [1, 1]} : vector<16x160xf32> to vector<16x32xf32>
    %27 = vector.extract_strided_slice %22 {offsets = [0, 128], sizes = [16, 32], strides = [1, 1]} : vector<16x160xf32> to vector<16x32xf32>
    %28 = tpu.concatenate %23, %24, %25, %26, %27 in 0 : vector<16x32xf32>, vector<16x32xf32>, vector<16x32xf32>, vector<16x32xf32>, vector<16x32xf32> -> vector<80x32xf32>
    %cst_18 = arith.constant dense<0.000000e+00> : vector<16x32xf32>
    %29 = tpu.matmul %1, %28, %cst_18 {dimension_numbers = #tpu.dot_dimension_numbers<[1], [0], [0], [1], [0, 0, 1, 1], [], []>} : vector<16x80xf32>, vector<80x32xf32>, vector<16x32xf32> -> vector<16x32xf32>
    %cst_19 = arith.constant dense<0.000000e+00> : vector<16x32xf32>
    %30 = tpu.matmul %18, %20, %cst_19 {dimension_numbers = #tpu.dot_dimension_numbers<[1], [0], [0], [1], [0, 0, 1, 1], [], []>} : vector<16x32xf32>, vector<32x32xf32>, vector<16x32xf32> -> vector<16x32xf32>
    %31 = arith.addf %29, %30 : vector<16x32xf32>
    %32 = vector.broadcast %21 : vector<1x32xf32> to vector<16x32xf32>
    %33 = arith.addf %31, %32 : vector<16x32xf32>
    %34 = math.tanh %33 : vector<16x32xf32>
    %c0_20 = arith.constant 0 : index
    %c0_21 = arith.constant 0 : index
    %35 = vector.load %arg11[%c0_20, %c0_21] : memref<32x160xf32, #tpu.memory_space<vmem>>, vector<32x160xf32>
    %c0_22 = arith.constant 0 : index
    %c0_23 = arith.constant 0 : index
    %36 = vector.load %arg12[%c0_22, %c0_23] : memref<32x32xf32, #tpu.memory_space<vmem>>, vector<32x32xf32>
    %c0_24 = arith.constant 0 : index
    %c0_25 = arith.constant 0 : index
    %37 = vector.load %arg13[%c0_24, %c0_25] : memref<1x32xf32, #tpu.memory_space<vmem>>, vector<1x32xf32>
    %cst_26 = arith.constant dense<0.000000e+00> : vector<16x160xf32>
    %38 = tpu.matmul %34, %35, %cst_26 {dimension_numbers = #tpu.dot_dimension_numbers<[1], [0], [0], [1], [0, 0, 1, 1], [], []>} : vector<16x32xf32>, vector<32x160xf32>, vector<16x160xf32> -> vector<16x160xf32>
    %39 = vector.extract_strided_slice %38 {offsets = [0, 0], sizes = [16, 32], strides = [1, 1]} : vector<16x160xf32> to vector<16x32xf32>
    %40 = vector.extract_strided_slice %38 {offsets = [0, 32], sizes = [16, 32], strides = [1, 1]} : vector<16x160xf32> to vector<16x32xf32>
    %41 = vector.extract_strided_slice %38 {offsets = [0, 64], sizes = [16, 32], strides = [1, 1]} : vector<16x160xf32> to vector<16x32xf32>
    %42 = vector.extract_strided_slice %38 {offsets = [0, 96], sizes = [16, 32], strides = [1, 1]} : vector<16x160xf32> to vector<16x32xf32>
    %43 = vector.extract_strided_slice %38 {offsets = [0, 128], sizes = [16, 32], strides = [1, 1]} : vector<16x160xf32> to vector<16x32xf32>
    %44 = tpu.concatenate %39, %40, %41, %42, %43 in 0 : vector<16x32xf32>, vector<16x32xf32>, vector<16x32xf32>, vector<16x32xf32>, vector<16x32xf32> -> vector<80x32xf32>
    %cst_27 = arith.constant dense<0.000000e+00> : vector<16x32xf32>
    %45 = tpu.matmul %1, %44, %cst_27 {dimension_numbers = #tpu.dot_dimension_numbers<[1], [0], [0], [1], [0, 0, 1, 1], [], []>} : vector<16x80xf32>, vector<80x32xf32>, vector<16x32xf32> -> vector<16x32xf32>
    %cst_28 = arith.constant dense<0.000000e+00> : vector<16x32xf32>
    %46 = tpu.matmul %34, %36, %cst_28 {dimension_numbers = #tpu.dot_dimension_numbers<[1], [0], [0], [1], [0, 0, 1, 1], [], []>} : vector<16x32xf32>, vector<32x32xf32>, vector<16x32xf32> -> vector<16x32xf32>
    %47 = arith.addf %45, %46 : vector<16x32xf32>
    %48 = vector.broadcast %37 : vector<1x32xf32> to vector<16x32xf32>
    %49 = arith.addf %47, %48 : vector<16x32xf32>
    %50 = math.tanh %49 : vector<16x32xf32>
    %c0_29 = arith.constant 0 : index
    %c0_30 = arith.constant 0 : index
    %51 = vector.load %arg14[%c0_29, %c0_30] : memref<32x160xf32, #tpu.memory_space<vmem>>, vector<32x160xf32>
    %c0_31 = arith.constant 0 : index
    %c0_32 = arith.constant 0 : index
    %52 = vector.load %arg15[%c0_31, %c0_32] : memref<32x32xf32, #tpu.memory_space<vmem>>, vector<32x32xf32>
    %c0_33 = arith.constant 0 : index
    %c0_34 = arith.constant 0 : index
    %53 = vector.load %arg16[%c0_33, %c0_34] : memref<1x32xf32, #tpu.memory_space<vmem>>, vector<1x32xf32>
    %cst_35 = arith.constant dense<0.000000e+00> : vector<16x160xf32>
    %54 = tpu.matmul %50, %51, %cst_35 {dimension_numbers = #tpu.dot_dimension_numbers<[1], [0], [0], [1], [0, 0, 1, 1], [], []>} : vector<16x32xf32>, vector<32x160xf32>, vector<16x160xf32> -> vector<16x160xf32>
    %55 = vector.extract_strided_slice %54 {offsets = [0, 0], sizes = [16, 32], strides = [1, 1]} : vector<16x160xf32> to vector<16x32xf32>
    %56 = vector.extract_strided_slice %54 {offsets = [0, 32], sizes = [16, 32], strides = [1, 1]} : vector<16x160xf32> to vector<16x32xf32>
    %57 = vector.extract_strided_slice %54 {offsets = [0, 64], sizes = [16, 32], strides = [1, 1]} : vector<16x160xf32> to vector<16x32xf32>
    %58 = vector.extract_strided_slice %54 {offsets = [0, 96], sizes = [16, 32], strides = [1, 1]} : vector<16x160xf32> to vector<16x32xf32>
    %59 = vector.extract_strided_slice %54 {offsets = [0, 128], sizes = [16, 32], strides = [1, 1]} : vector<16x160xf32> to vector<16x32xf32>
    %60 = tpu.concatenate %55, %56, %57, %58, %59 in 0 : vector<16x32xf32>, vector<16x32xf32>, vector<16x32xf32>, vector<16x32xf32>, vector<16x32xf32> -> vector<80x32xf32>
    %cst_36 = arith.constant dense<0.000000e+00> : vector<16x32xf32>
    %61 = tpu.matmul %1, %60, %cst_36 {dimension_numbers = #tpu.dot_dimension_numbers<[1], [0], [0], [1], [0, 0, 1, 1], [], []>} : vector<16x80xf32>, vector<80x32xf32>, vector<16x32xf32> -> vector<16x32xf32>
    %cst_37 = arith.constant dense<0.000000e+00> : vector<16x32xf32>
    %62 = tpu.matmul %50, %52, %cst_37 {dimension_numbers = #tpu.dot_dimension_numbers<[1], [0], [0], [1], [0, 0, 1, 1], [], []>} : vector<16x32xf32>, vector<32x32xf32>, vector<16x32xf32> -> vector<16x32xf32>
    %63 = arith.addf %61, %62 : vector<16x32xf32>
    %64 = vector.broadcast %53 : vector<1x32xf32> to vector<16x32xf32>
    %65 = arith.addf %63, %64 : vector<16x32xf32>
    %66 = math.tanh %65 : vector<16x32xf32>
    %67 = tpu.concatenate %18, %34, %50, %66 in 1 : vector<16x32xf32>, vector<16x32xf32>, vector<16x32xf32>, vector<16x32xf32> -> vector<16x128xf32>
    %c0_38 = arith.constant 0 : index
    %c0_39 = arith.constant 0 : index
    %68 = vector.load %arg3[%c0_38, %c0_39] : memref<2x16xf32, #tpu.memory_space<vmem>>, vector<2x16xf32>
    %cst_40 = arith.constant dense<0.000000e+00> : vector<2x128xf32>
    %69 = tpu.matmul %68, %67, %cst_40 {dimension_numbers = #tpu.dot_dimension_numbers<[1], [0], [0], [1], [0, 0, 1, 1], [], []>} : vector<2x16xf32>, vector<16x128xf32>, vector<2x128xf32> -> vector<2x128xf32>
    %c0_41 = arith.constant 0 : index
    %c0_42 = arith.constant 0 : index
    %70 = vector.load %arg4[%c0_41, %c0_42] : memref<2x16xf32, #tpu.memory_space<vmem>>, vector<2x16xf32>
    %cst_43 = arith.constant dense<0.000000e+00> : vector<2x128xf32>
    %71 = tpu.matmul %70, %67, %cst_43 {dimension_numbers = #tpu.dot_dimension_numbers<[1], [0], [0], [1], [0, 0, 1, 1], [], []>} : vector<2x16xf32>, vector<16x128xf32>, vector<2x128xf32> -> vector<2x128xf32>
    %72 = tpu.concatenate %69, %71 in 1 : vector<2x128xf32>, vector<2x128xf32> -> vector<2x256xf32>
    %c0_44 = arith.constant 0 : index
    %c0_45 = arith.constant 0 : index
    %73 = vector.load %arg17[%c0_44, %c0_45] : memref<256x128xf32, #tpu.memory_space<vmem>>, vector<256x128xf32>
    %cst_46 = arith.constant dense<0.000000e+00> : vector<2x128xf32>
    %74 = tpu.matmul %72, %73, %cst_46 {dimension_numbers = #tpu.dot_dimension_numbers<[1], [0], [0], [1], [0, 0, 1, 1], [], []>} : vector<2x256xf32>, vector<256x128xf32>, vector<2x128xf32> -> vector<2x128xf32>
    %c0_47 = arith.constant 0 : index
    %c0_48 = arith.constant 0 : index
    %75 = vector.load %arg18[%c0_47, %c0_48] : memref<1x128xf32, #tpu.memory_space<vmem>>, vector<1x128xf32>
    %76 = vector.broadcast %75 : vector<1x128xf32> to vector<2x128xf32>
    %77 = arith.addf %74, %76 : vector<2x128xf32>
    %cst_49 = arith.constant 0.000000e+00 : f32
    %78 = vector.broadcast %cst_49 : f32 to vector<2x128xf32>
    %79 = arith.maximumf %77, %78 : vector<2x128xf32>
    %c0_50 = arith.constant 0 : index
    %c0_51 = arith.constant 0 : index
    %80 = vector.load %arg19[%c0_50, %c0_51] : memref<128x1xf32, #tpu.memory_space<vmem>>, vector<128x1xf32>
    %cst_52 = arith.constant dense<0.000000e+00> : vector<2x1xf32>
    %81 = tpu.matmul %79, %80, %cst_52 {dimension_numbers = #tpu.dot_dimension_numbers<[1], [0], [0], [1], [0, 0, 1, 1], [], []>} : vector<2x128xf32>, vector<128x1xf32>, vector<2x1xf32> -> vector<2x1xf32>
    %c0_53 = arith.constant 0 : index
    %c0_54 = arith.constant 0 : index
    %82 = vector.load %arg20[%c0_53, %c0_54] : memref<1x1xf32, #tpu.memory_space<vmem>>, vector<1x1xf32>
    %83 = vector.broadcast %82 : vector<1x1xf32> to vector<2x1xf32>
    %84 = arith.addf %81, %83 : vector<2x1xf32>
    %cst_55 = arith.constant 1.000000e+00 : f32
    %85 = vector.broadcast %cst_55 : f32 to vector<2x1xf32>
    %86 = arith.mulf %84, %85 : vector<2x1xf32>
    %c0_56 = arith.constant 0 : index
    %c0_57 = arith.constant 0 : index
    %87 = vector.load %arg21[%c0_56, %c0_57] : memref<2x1xf32, #tpu.memory_space<vmem>>, vector<2x1xf32>
    tpu.vector_store %arg21[%c0_56, %c0_57], %86 {strides = array<i32>} : memref<2x1xf32, #tpu.memory_space<vmem>>, vector<2x1xf32>,
    return
  }
  func.func @transform_0(%arg0: i32) -> (i32, i32) {
    %c0_i32 = arith.constant 0 : i32
    %c0_i32_0 = arith.constant 0 : i32
    %c0_i32_1 = arith.constant 0 : i32
    return %c0_i32, %c0_i32_0 : i32, i32
  }
  func.func @transform_1(%arg0: i32) -> (i32, i32) {
    %c0_i32 = arith.constant 0 : i32
    %c0_i32_0 = arith.constant 0 : i32
    %c0_i32_1 = arith.constant 0 : i32
    return %c0_i32, %c0_i32_0 : i32, i32
  }
  func.func @transform_2(%arg0: i32) -> (i32, i32) {
    %c0_i32 = arith.constant 0 : i32
    %c0_i32_0 = arith.constant 0 : i32
    %c0_i32_1 = arith.constant 0 : i32
    return %c0_i32, %c0_i32_0 : i32, i32
  }
  func.func @transform_3(%arg0: i32) -> (i32, i32) {
    %c0_i32 = arith.constant 0 : i32
    %c0_i32_0 = arith.constant 0 : i32
    %c0_i32_1 = arith.constant 0 : i32
    return %c0_i32, %c0_i32_0 : i32, i32
  }
  func.func @transform_4(%arg0: i32) -> (i32, i32) {
    %c0_i32 = arith.constant 0 : i32
    %c0_i32_0 = arith.constant 0 : i32
    %c0_i32_1 = arith.constant 0 : i32
    return %c0_i32, %c0_i32_0 : i32, i32
  }
  func.func @transform_5(%arg0: i32) -> (i32, i32) {
    %c0_i32 = arith.constant 0 : i32
    %c0_i32_0 = arith.constant 0 : i32
    %c0_i32_1 = arith.constant 0 : i32
    return %c0_i32, %c0_i32_0 : i32, i32
  }
  func.func @transform_6(%arg0: i32) -> (i32, i32) {
    %c0_i32 = arith.constant 0 : i32
    %c0_i32_0 = arith.constant 0 : i32
    %c0_i32_1 = arith.constant 0 : i32
    return %c0_i32, %c0_i32_0 : i32, i32
  }
  func.func @transform_7(%arg0: i32) -> (i32, i32) {
    %c0_i32 = arith.constant 0 : i32
    %c0_i32_0 = arith.constant 0 : i32
    %c0_i32_1 = arith.constant 0 : i32
    return %c0_i32, %c0_i32_0 : i32, i32
  }
  func.func @transform_8(%arg0: i32) -> (i32, i32) {
    %c0_i32 = arith.constant 0 : i32
    %c0_i32_0 = arith.constant 0 : i32
    %c0_i32_1 = arith.constant 0 : i32
    return %c0_i32, %c0_i32_0 : i32, i32
  }
  func.func @transform_9(%arg0: i32) -> (i32, i32) {
    %c0_i32 = arith.constant 0 : i32
    %c0_i32_0 = arith.constant 0 : i32
    %c0_i32_1 = arith.constant 0 : i32
    return %c0_i32, %c0_i32_0 : i32, i32
  }
  func.func @transform_10(%arg0: i32) -> (i32, i32) {
    %c0_i32 = arith.constant 0 : i32
    %c0_i32_0 = arith.constant 0 : i32
    %c0_i32_1 = arith.constant 0 : i32
    return %c0_i32, %c0_i32_0 : i32, i32
  }
  func.func @transform_11(%arg0: i32) -> (i32, i32) {
    %c0_i32 = arith.constant 0 : i32
    %c0_i32_0 = arith.constant 0 : i32
    %c0_i32_1 = arith.constant 0 : i32
    return %c0_i32, %c0_i32_0 : i32, i32
  }
  func.func @transform_12(%arg0: i32) -> (i32, i32) {
    %c0_i32 = arith.constant 0 : i32
    %c0_i32_0 = arith.constant 0 : i32
    %c0_i32_1 = arith.constant 0 : i32
    return %c0_i32, %c0_i32_0 : i32, i32
  }
  func.func @transform_13(%arg0: i32) -> (i32, i32) {
    %c0_i32 = arith.constant 0 : i32
    %c0_i32_0 = arith.constant 0 : i32
    %c0_i32_1 = arith.constant 0 : i32
    return %c0_i32, %c0_i32_0 : i32, i32
  }
  func.func @transform_14(%arg0: i32) -> (i32, i32) {
    %c0_i32 = arith.constant 0 : i32
    %c0_i32_0 = arith.constant 0 : i32
    %c0_i32_1 = arith.constant 0 : i32
    return %c0_i32, %c0_i32_0 : i32, i32
  }
  func.func @transform_15(%arg0: i32) -> (i32, i32) {
    %c0_i32 = arith.constant 0 : i32
    %c0_i32_0 = arith.constant 0 : i32
    %c0_i32_1 = arith.constant 0 : i32
    return %c0_i32, %c0_i32_0 : i32, i32
  }
  func.func @transform_16(%arg0: i32) -> (i32, i32) {
    %c0_i32 = arith.constant 0 : i32
    %c0_i32_0 = arith.constant 0 : i32
    %c0_i32_1 = arith.constant 0 : i32
    return %c0_i32, %c0_i32_0 : i32, i32
  }
  func.func @transform_17(%arg0: i32) -> (i32, i32) {
    %c0_i32 = arith.constant 0 : i32
    %c0_i32_0 = arith.constant 0 : i32
    %c0_i32_1 = arith.constant 0 : i32
    return %c0_i32, %c0_i32_0 : i32, i32
  }
  func.func @transform_18(%arg0: i32) -> (i32, i32) {
    %c0_i32 = arith.constant 0 : i32
    %c0_i32_0 = arith.constant 0 : i32
    %c0_i32_1 = arith.constant 0 : i32
    return %c0_i32, %c0_i32_0 : i32, i32
  }
  func.func @transform_19(%arg0: i32) -> (i32, i32) {
    %c0_i32 = arith.constant 0 : i32
    %c0_i32_0 = arith.constant 0 : i32
    %c0_i32_1 = arith.constant 0 : i32
    return %c0_i32, %c0_i32_0 : i32, i32
  }
  func.func @transform_20(%arg0: i32) -> (i32, i32) {
    %c0_i32 = arith.constant 0 : i32
    %c0_i32_0 = arith.constant 0 : i32
    %c0_i32_1 = arith.constant 0 : i32
    return %c0_i32, %c0_i32_0 : i32, i32
  }
}

</mosaic_0001>

<bundles_post_ra>
// kernel: igmc_forward.1
= control target key start
LH: loop header
LB: loop body
LE: loop exit
PB: predicated region body
PF: predicated region fallthrough
CT: control target
= control target key end

     0   :  { %vm85_vm0 = vcmask 1043456   ;;  %v2213_v1 = vmov 0.0   ;;  %vm78_vm1 = vcmask 31744   ;;  %s2214_s29 = smov 32   ;;  %s2215_s30 = smov 96   ;;  %vm265_vm2 = vcmask 654336   ;;  %s2720_s4 = inlined_call_operand.vmem [shape: f32[4,160], index: 4, kind: input, shape index: {}]   ;;  %s2721_s0 = inlined_call_operand.vmem [shape: f32[16,4], index: 0, kind: input, shape index: {}]   ;;  %s2722_s5 = inlined_call_operand.vmem [shape: f32[4,32], index: 5, kind: input, shape index: {}]   ;;  %s2723_s1 = inlined_call_operand.vmem [shape: bf16[16,80], index: 1, kind: input, shape index: {}]   ;;  %s2724_s7 = inlined_call_operand.vmem [shape: f32[32,160], index: 7, kind: input, shape index: {}]   ;;  %s2725_s8 = inlined_call_operand.vmem [shape: f32[32,32], index: 8, kind: input, shape index: {}]   ;;  %s2726_s6 = inlined_call_operand.vmem [shape: f32[1,32], index: 6, kind: input, shape index: {}]   ;;  %s2727_s10 = inlined_call_operand.vmem [shape: f32[32,160], index: 10, kind: input, shape index: {}]   ;;  %s2728_s11 = inlined_call_operand.vmem [shape: f32[32,32], index: 11, kind: input, shape index: {}]   ;;  %s2729_s9 = inlined_call_operand.vmem [shape: f32[1,32], index: 9, kind: input, shape index: {}]   ;;  %s2730_s13 = inlined_call_operand.vmem [shape: f32[32,160], index: 13, kind: input, shape index: {}]   ;;  %s2731_s14 = inlined_call_operand.vmem [shape: f32[32,32], index: 14, kind: input, shape index: {}]   ;;  %s2732_s12 = inlined_call_operand.vmem [shape: f32[1,32], index: 12, kind: input, shape index: {}]   ;;  %s2733_s15 = inlined_call_operand.vmem [shape: f32[1,32], index: 15, kind: input, shape index: {}]   ;;  %s2734_s16 = inlined_call_operand.vmem [shape: f32[256,128], index: 16, kind: input, shape index: {}]   ;;  %s2735_s2 = inlined_call_operand.vmem [shape: f32[2,16], index: 2, kind: input, shape index: {}]   ;;  %s2736_s3 = inlined_call_operand.vmem [shape: f32[2,16], index: 3, kind: input, shape index: {}]   ;;  %s2737_s18 = inlined_call_operand.vmem [shape: f32[128,1], index: 18, kind: input, shape index: {}]   ;;  %s2738_s19 = inlined_call_operand.<no memory space> [shape: f32[1,1], index: 19, kind: input, shape index: {}]   ;;  %s2739_s17 = inlined_call_operand.vmem [shape: f32[1,128], index: 17, kind: input, shape index: {}]   ;;  %s2740_s20 = inlined_call_operand.vmem [shape: f32[2,1], index: 20, kind: output, shape index: {}]  }
   0x1   :  { %2743 = sst [smem:[#allocation3_spill]] %s2720_s4  ;;  %154 = vmatprep.mubr.f32.mxu0 %v2213_v1  ;;  %s2216_s4 = smov 64   ;;  %v365_v40 = vld [vmem:[%s2725_s8] sm:$0xff]  ;;  %v366_v41 = vld [vmem:[%s2725_s8 + $0x8] sm:$0xff]  ;;  %v367_v48 = vld [vmem:[%s2725_s8 + $0x10] sm:$0xff]  ;;  %vm370_vm3 = vcmask 261120  }
   0x2   :  { %2744 = sst [smem:[#allocation4_spill]] %s2721_s0  ;;  %s2748_s23 = sld [smem:[#allocation3_spill]]  ;;  %v1945_v42 = vpack.c.bf16 %v366_v41, %v365_v40  ;;  %v1581_v43 = vld [vmem:[%s2726_s6] ss:$0 sm:$0xff]  ;;  %v368_v49 = vld [vmem:[%s2725_s8 + $0x18] sm:$0xff]  ;;  %vm2218_vm4 = vmmov 0  }
   0x3   :  { %2745 = sst [smem:[#allocation5_spill]] %s2722_s5  ;;  %s2749_s25 = sld [smem:[#allocation4_spill]]  ;;  %v1949_v50 = vpack.c.bf16 %v368_v49, %v367_v48  ;;  %vm1208_vm5 = vcmask 523264   ;;  %vm1211_vm6 = vcmask 785408   ;;  %vm1215_vm7 = vcmask 130048  }
   0x4   :  { %2746 = sst [smem:[#allocation6_spill]] %s2723_s1  ;;  %vm1566_vm8 = vcmask 1024  }
   0x5   :  { %2747 = sst [smem:[#allocation7_spill]] %s2724_s7  ;;  %s2750_s7 = sld [smem:[#allocation5_spill]] }
   0x6   :  { %s2751_s22 = sld [smem:[#allocation6_spill]]  ;;  %s2752_s5 = sld [smem:[#allocation7_spill]] }
   0x8   :  { %v73_v0 = vld [vmem:[%s2748_s23] sm:$0xff] }
   0x9   :  { %v71_v2 = vld [vmem:[%s2749_s25] sm:$0xff]  ;;  %v77_v3 = vcombine.high %v73_v0, %v73_v0  ;;  %v72_v4 = vld [vmem:[%s2749_s25 + $0x8] sm:$0xff] }
   0xa   :  { %1740 = vmatprep.mubr.msk.f32.mxu1 %vm78_vm1, %v71_v2 }
   0xb   :  { %1572 = vmatprep.subr.msk.mxu0 %vm85_vm0, %v77_v3  ;;  %v74_v5 = vld [vmem:[%s2750_s7] sm:$0xf] }
   0xc   :  { %1573 = vmatpush1.msk.msra.mxu0 %vm85_vm0, %v73_v0  ;;  %1738 = vmatprep.subr.msk.mxu1 %vm85_vm0, %v74_v5  ;;  %v1608_v13 = vld [vmem:[%s2751_s22] sm:$0xff]   ;;  %v358_v28 = vld [vmem:[%s2752_s5 + $0x8] sm:$0xff]  ;;  %v360_v29 = vld [vmem:[%s2752_s5 + $0x18] sm:$0xff] }
   0xd   :  { %1574 = vmatmul.mubr.msk.f32.vlgmr.msra.gmra.mrb[0].mxu0 %vm78_vm1, %v71_v2  ;;  %1739 = vmatpush3.msk.msra.mxu1 %vm85_vm0, %v74_v5  ;;  %v2349_v14 = vunpack.c.l.bf16 %v1608_v13  ;;  %v2353_v27 = vunpack.c.h.bf16 %v1608_v13  ;;  %v357_v30 = vld [vmem:[%s2752_s5] sm:$0xff]  ;;  %v1937_v31 = vpack.c.bf16 %v360_v29, %v358_v28  ;;  %v359_v32 = vld [vmem:[%s2752_s5 + $0x10] sm:$0xff]  ;;  %v362_v33 = vld [vmem:[%s2752_s5 + $0x28] sm:$0xff] }
   0xe   :  { %160 = vmatprep.mubr.f32.mxu0 %v2213_v1  ;;  %1741 = vmatmul.mubr.msk.f32.vlgmr.msra.gmra.mrb[0].mxu1 %vm78_vm1, %v72_v4  ;;  %v364_v34 = vld [vmem:[%s2752_s5 + $0x38] sm:$0xff]  ;;  %v1939_v35 = vpack.c.bf16 %v359_v32, %v357_v30  ;;  %v361_v37 = vld [vmem:[%s2752_s5 + $0x20] sm:$0xff]  ;;  %v363_v38 = vld [vmem:[%s2752_s5 + $0x30] sm:$0xff] }
   0xf   :  { %1763 = vmatprep.mubr.msk.f32.mxu1 %vm265_vm2, %v2349_v14  ;;  %v1941_v36 = vpack.c.bf16 %v364_v34, %v362_v33  ;;  %1938 = vmatprep.subr.bf16.mxu0 %v1937_v31  ;;  %v1943_v39 = vpack.c.bf16 %v363_v38, %v361_v37  ;;  %v636_v13 = vld [vmem:[%s2727_s10 + $0x10] sm:$0xff]  ;;  %v645_v32 = vld [vmem:[%s2728_s11 + $0x18] sm:$0xff] }
  0x10   :  { %1940 = vmatpush1.bf16.msra.mxu0 %v1939_v35  ;;  %v644_v31 = vld [vmem:[%s2728_s11 + $0x10] sm:$0xff] }
  0x11   :  { %1575 = vmatmul.mubr.msk.f32.gmra.mrb[2].mxu0 %vm78_vm1, %v72_v4  ;;  %1942 = vmatprep.subr.bf16.mxu0 %v1941_v36  ;;  %v1985_v34 = vpack.c.bf16 %v645_v32, %v644_v31 }
  0x12   :  { %441 = vmatprep.mubr.f32.mxu0 %v2213_v1 }
  0x14   :  { %1944 = vmatpush1.bf16.msra.mxu0 %v1943_v39 }
  0x15   :  { %1946 = vmatprep.subr.bf16.mxu0 %v1945_v42 }
  0xe0   :  { %v156_v6 = vpop.f32.mrb[0].mxu0 }
  0xe1   :  { %v158_v7 = vpop.f32.mrb[1].mxu0 }
  0xe4   :  { %v162_v8 = vpop.f32.mrb[2].mxu0 }
  0xe5   :  { %v164_v9 = vpop.f32.mrb[3].mxu0  ;;  %v2131_v10 = vpack.i.bf16 %v162_v8, %v156_v6  ;;  %v1917_v11 = vpack.c.bf16 %v162_v8, %v156_v6 }
  0xe6   :  { %v1933_v12 = vpack.c.bf16 %v164_v9, %v158_v7  ;;  %v635_v9 = vld [vmem:[%s2727_s10 + $0x8] sm:$0xff] }
  0xe7   :  { %2132 = vrot.lane.b32.xlu1 %v2131_v10, %s2214_s29  ;;  %2122 = vrot.lane.b32.xlu0 %v2131_v10, %s2215_s30 }
  0xe8   :  { %1918 = vmatprep.subr.bf16.mxu1 %v1917_v11 }
  0xe9   :  { %1920 = vmatpush3.bf16.msra.mxu1 %v1917_v11  ;;  %v634_v11 = vld [vmem:[%s2727_s10] sm:$0xff] }
  0xeb   :  { %2127 = vrot.lane.b32.xlu0 %v2131_v10, %s2216_s4  ;;  %v637_v10 = vld [vmem:[%s2727_s10 + $0x18] sm:$0xff] }
 0x159   :  { %v2123_v15 = vpop.permute.xlu0 %2122  ;;  %v2133_v18 = vpop.permute.xlu1 %2132 }
 0x15a   :  { %v2125_v16 = vunpack.i.h.bf16 %v2123_v15  ;;  %v2124_v17 = vunpack.i.l.bf16 %v2123_v15  ;;  %v2135_v21 = vunpack.i.h.bf16 %v2133_v18  ;;  %v2134_v22 = vunpack.i.l.bf16 %v2133_v18  ;;  %v639_v15 = vld [vmem:[%s2727_s10 + $0x28] sm:$0xff] }
 0x15c   :  { %v1921_v19 = vpack.c.bf16 %v2125_v16, %v2124_v17  ;;  %v1929_v26 = vpack.c.bf16 %v2135_v21, %v2134_v22  ;;  %v641_v16 = vld [vmem:[%s2727_s10 + $0x38] sm:$0xff]  ;;  %v1975_v17 = vpack.c.bf16 %v636_v13, %v634_v11  ;;  %v642_v22 = vld [vmem:[%s2728_s11] sm:$0xff] }
 0x15d   :  { %v2128_v20 = vpop.permute.xlu0 %2127  ;;  %v1977_v18 = vpack.c.bf16 %v641_v16, %v639_v15  ;;  %v920_v16 = vld [vmem:[%s2731_s14 + $0x10] sm:$0xff] }
 0x15e   :  { %v2130_v23 = vunpack.i.h.bf16 %v2128_v20  ;;  %v2129_v24 = vunpack.i.l.bf16 %v2128_v20  ;;  %1922 = vmatprep.subr.bf16.mxu1 %v1921_v19  ;;  %v640_v20 = vld [vmem:[%s2727_s10 + $0x30] sm:$0xff] }
 0x15f   :  { %1924 = vmatpush3.bf16.msra.mxu1 %v1921_v19  ;;  %v638_v19 = vld [vmem:[%s2727_s10 + $0x20] sm:$0xff] }
 0x160   :  { %v1925_v25 = vpack.c.bf16 %v2130_v23, %v2129_v24  ;;  %v1979_v21 = vpack.c.bf16 %v640_v20, %v638_v19  ;;  %v643_v23 = vld [vmem:[%s2728_s11 + $0x8] sm:$0xff] }
 0x161   :  { %v1981_v24 = vpack.c.bf16 %v643_v23, %v642_v22 }
 0x162   :  { %1926 = vmatprep.subr.bf16.mxu1 %v1925_v25 }
 0x163   :  { %1928 = vmatpush3.bf16.msra.mxu1 %v1925_v25  ;;  %v1588_v25 = vld [vmem:[%s2729_s9] ss:$0 sm:$0xff] }
 0x164   :  { %1930 = vmatprep.subr.bf16.mxu1 %v1929_v26 }
 0x167   :  { %1932 = vmatpush3.bf16.msra.mxu1 %v1929_v26 }
 0x168   :  { %1934 = vmatprep.subr.bf16.mxu1 %v1933_v12 }
 0x16b   :  { %1936 = vmatpush3.bf16.msra.mxu1 %v1933_v12  ;;  %v1973_v12 = vpack.c.bf16 %v637_v10, %v635_v9  ;;  %v1595_v10 = vld [vmem:[%s2732_s12] ss:$0 sm:$0xff] }
 0x16d   :  { %1974 = vmatprep.subr.bf16.mxu1 %v1973_v12 }
 0x16e   :  { %1764 = vmatmul.mubr.msk.f32.vlgmr.msra.gmra.mrb[0].mxu1 %vm265_vm2, %v2353_v27 }
 0x16f   :  { %717 = vmatprep.mubr.f32.mxu1 %v2213_v1  ;;  %1976 = vmatpush1.bf16.msra.mxu1 %v1975_v17  ;;  %v921_v17 = vld [vmem:[%s2731_s14 + $0x18] sm:$0xff] }
 0x170   :  { %1978 = vmatprep.subr.bf16.mxu1 %v1977_v18  ;;  %v2021_v19 = vpack.c.bf16 %v921_v17, %v920_v16  ;;  %v1383_v16 = vld [vmem:[%s2734_s16 + $0xa0] sm:$0xff] }
 0x173   :  { %1980 = vmatpush1.bf16.msra.mxu1 %v1979_v21 }
 0x174   :  { %1982 = vmatprep.subr.bf16.mxu1 %v1981_v24 }
 0x241   :  { %v1765_v44 = vpop.f32.mrb[0].mxu1 }
 0x242   :  { %v338_v45 = vpop.f32.mrb[1].mxu1  ;;  %v354_v47 = vadd.f32 %v1765_v44, %v1581_v43 }
 0x243   :  { %v353_v46 = vadd.f32 %v1581_v43, %v338_v45 }
 0x245   :  { %2197 = vtanh.f32 %v353_v46 }
 0x246   :  { %2199 = vtanh.f32 %v354_v47 }
 0x24f   :  { %v2397_v51 = vpop.eup %2197 }
 0x250   :  { %1582 = vmatmul.mubr.msk.f32.vlgmr.msra.gmra.mrb[4].mxu0 %vm370_vm3, %v2397_v51  ;;  %v2402_v52 = vpop.eup %2199 }
 0x251   :  { %1948 = vmatpush3.bf16.msra.mxu0 %v1945_v42  ;;  %447 = vmatprep.mubr.f32.mxu0 %v2213_v1 }
 0x252   :  { %1950 = vmatprep.subr.bf16.mxu0 %v1949_v50 }
 0x254   :  { %1583 = vmatmul.mubr.msk.f32.gmra.mrb[6].mxu0 %vm370_vm3, %v2402_v52 }
 0x255   :  { %1952 = vmatpush3.bf16.msra.mxu0 %v1949_v50  ;;  %1774 = vmatprep.mubr.msk.f32.mxu0 %vm370_vm3, %v2397_v51 }
 0x258   :  { %1775 = vmatmul.mubr.msk.f32.vlgmr.msra.gmra.mrb[8].mxu0 %vm370_vm3, %v2402_v52 }
 0x259   :  { %1797 = vmatprep.mubr.msk.f32.mxu0 %vm265_vm2, %v2349_v14 }
 0x323   :  { %v443_v53 = vpop.f32.mrb[4].mxu0 }
 0x324   :  { %v445_v54 = vpop.f32.mrb[5].mxu0 }
 0x327   :  { %v449_v55 = vpop.f32.mrb[6].mxu0 }
 0x328   :  { %v451_v56 = vpop.f32.mrb[7].mxu0  ;;  %v2141_v57 = vpack.i.bf16 %v449_v55, %v443_v53  ;;  %v1953_v58 = vpack.c.bf16 %v449_v55, %v443_v53 }
 0x329   :  { %v1969_v59 = vpack.c.bf16 %v451_v56, %v445_v54 }
 0x32a   :  { %2142 = vrot.lane.b32.xlu0 %v2141_v57, %s2216_s4  ;;  %2137 = vrot.lane.b32.xlu1 %v2141_v57, %s2215_s30 }
 0x32b   :  { %1954 = vmatprep.subr.bf16.mxu0 %v1953_v58 }
 0x32c   :  { %1956 = vmatpush3.bf16.msra.mxu0 %v1953_v58  ;;  %v911_v58 = vld [vmem:[%s2730_s13 + $0x8] sm:$0xff] }
 0x32e   :  { %2147 = vrot.lane.b32.xlu1 %v2141_v57, %s2214_s29 }
 0x39c   :  { %v2143_v60 = vpop.permute.xlu0 %2142  ;;  %v2138_v61 = vpop.permute.xlu1 %2137 }
 0x39d   :  { %v2145_v62 = vunpack.i.h.bf16 %v2143_v60  ;;  %v2144_v63 = vunpack.i.l.bf16 %v2143_v60  ;;  %v2140_v0 = vunpack.i.h.bf16 %v2138_v61  ;;  %v2139_v2 = vunpack.i.l.bf16 %v2138_v61  ;;  %v910_v60 = vld [vmem:[%s2730_s13] sm:$0xff] }
 0x39f   :  { %v1957_v3 = vpack.c.bf16 %v2140_v0, %v2139_v2  ;;  %v1961_v5 = vpack.c.bf16 %v2145_v62, %v2144_v63  ;;  %v912_v62 = vld [vmem:[%s2730_s13 + $0x10] sm:$0xff]  ;;  %v915_v63 = vld [vmem:[%s2730_s13 + $0x28] sm:$0xff]  ;;  %v917_v0 = vld [vmem:[%s2730_s13 + $0x38] sm:$0xff] }
 0x3a0   :  { %v2148_v4 = vpop.permute.xlu1 %2147  ;;  %v2011_v2 = vpack.c.bf16 %v912_v62, %v910_v60 }
 0x3a1   :  { %v2150_v6 = vunpack.i.h.bf16 %v2148_v4  ;;  %v2149_v7 = vunpack.i.l.bf16 %v2148_v4  ;;  %1958 = vmatprep.subr.bf16.mxu0 %v1957_v3  ;;  %v914_v4 = vld [vmem:[%s2730_s13 + $0x20] sm:$0xff] }
 0x3a2   :  { %1960 = vmatpush3.bf16.msra.mxu0 %v1957_v3  ;;  %v2013_v3 = vpack.c.bf16 %v917_v0, %v915_v63 }
 0x3a3   :  { %1962 = vmatprep.subr.bf16.mxu0 %v1961_v5  ;;  %v1965_v8 = vpack.c.bf16 %v2150_v6, %v2149_v7  ;;  %v918_v7 = vld [vmem:[%s2731_s14] sm:$0xff] }
 0x3a6   :  { %1964 = vmatpush3.bf16.msra.mxu0 %v1961_v5  ;;  %v916_v5 = vld [vmem:[%s2730_s13 + $0x30] sm:$0xff] }
 0x3a7   :  { %1966 = vmatprep.subr.bf16.mxu0 %v1965_v8  ;;  %v2015_v6 = vpack.c.bf16 %v916_v5, %v914_v4  ;;  %v1379_v4 = vld [vmem:[%s2734_s16 + $0x80] sm:$0xff]  ;;  %v1380_v5 = vld [vmem:[%s2734_s16 + $0x88] sm:$0xff] }
 0x3aa   :  { %1968 = vmatpush3.bf16.msra.mxu0 %v1965_v8  ;;  %v919_v8 = vld [vmem:[%s2731_s14 + $0x8] sm:$0xff] }
 0x3ab   :  { %1970 = vmatprep.subr.bf16.mxu0 %v1969_v59  ;;  %v2017_v9 = vpack.c.bf16 %v919_v8, %v918_v7  ;;  %v1364_v7 = vld [vmem:[%s2734_s16 + $0x8] sm:$0xff]  ;;  %v1381_v8 = vld [vmem:[%s2734_s16 + $0x90] sm:$0xff] }
 0x3ae   :  { %1972 = vmatpush3.bf16.msra.mxu0 %v1969_v59  ;;  %v913_v59 = vld [vmem:[%s2730_s13 + $0x18] sm:$0xff] }
 0x3af   :  { %v2009_v61 = vpack.c.bf16 %v913_v59, %v911_v58 }
 0x3b1   :  { %1798 = vmatmul.mubr.msk.f32.vlgmr.msra.gmra.mrb[8].mxu0 %vm265_vm2, %v2353_v27  ;;  %2010 = vmatprep.subr.bf16.mxu0 %v2009_v61 }
 0x3b2   :  { %993 = vmatprep.mubr.f32.mxu0 %v2213_v1  ;;  %2012 = vmatpush1.bf16.msra.mxu0 %v2011_v2 }
 0x3b3   :  { %2014 = vmatprep.subr.bf16.mxu0 %v2013_v3 }
 0x3b6   :  { %2016 = vmatpush1.bf16.msra.mxu0 %v2015_v6  ;;  %v1363_v6 = vld [vmem:[%s2734_s16] sm:$0xff] }
 0x3b7   :  { %2018 = vmatprep.subr.bf16.mxu0 %v2017_v9 }
 0x484   :  { %v1799_v26 = vpop.f32.mrb[8].mxu0 }
 0x485   :  { %v631_v28 = vadd.f32 %v1799_v26, %v1588_v25  ;;  %v615_v29 = vpop.f32.mrb[9].mxu0 }
 0x486   :  { %v630_v30 = vadd.f32 %v1588_v25, %v615_v29 }
 0x487   :  { %2201 = vtanh.f32 %v631_v28 }
 0x488   :  { %2203 = vtanh.f32 %v630_v30 }
 0x491   :  { %v2457_v33 = vpop.eup %2201 }
 0x492   :  { %v2459_v35 = vpop.eup %2203 }
 0x493   :  { %1589 = vmatmul.mubr.msk.f32.vlgmr.msra.gmra.mrb[2].mxu1 %vm370_vm3, %v2459_v35  ;;  %v2181_v36 = vpack.i.bf16 %v2457_v33, %v2459_v35 }
 0x494   :  { %1984 = vmatpush3.bf16.msra.mxu1 %v1981_v24  ;;  %723 = vmatprep.mubr.f32.mxu1 %v2213_v1 }
 0x495   :  { %1986 = vmatprep.subr.bf16.mxu1 %v1985_v34 }
 0x497   :  { %1590 = vmatmul.mubr.msk.f32.gmra.mrb[4].mxu1 %vm370_vm3, %v2457_v33 }
 0x498   :  { %1988 = vmatpush3.bf16.msra.mxu1 %v1985_v34  ;;  %1808 = vmatprep.mubr.msk.f32.mxu1 %vm370_vm3, %v2459_v35  ;;  %v1602_v35 = vld [vmem:[%s2733_s15] ss:$0 sm:$0xff] }
 0x49b   :  { %1809 = vmatmul.mubr.msk.f32.vlgmr.msra.gmra.mrb[6].mxu1 %vm370_vm3, %v2457_v33 }
 0x49c   :  { %1831 = vmatprep.mubr.msk.f32.mxu1 %vm265_vm2, %v2349_v14 }
 0x566   :  { %v719_v37 = vpop.f32.mrb[2].mxu1 }
 0x567   :  { %v721_v38 = vpop.f32.mrb[3].mxu1 }
 0x56a   :  { %v725_v39 = vpop.f32.mrb[4].mxu1 }
 0x56b   :  { %v727_v40 = vpop.f32.mrb[5].mxu1  ;;  %v2156_v41 = vpack.i.bf16 %v725_v39, %v719_v37  ;;  %v1989_v42 = vpack.c.bf16 %v725_v39, %v719_v37 }
 0x56c   :  { %v2005_v43 = vpack.c.bf16 %v727_v40, %v721_v38 }
 0x56d   :  { %2157 = vrot.lane.b32.xlu1 %v2156_v41, %s2216_s4  ;;  %2152 = vrot.lane.b32.xlu0 %v2156_v41, %s2215_s30 }
 0x56e   :  { %1990 = vmatprep.subr.bf16.mxu1 %v1989_v42 }
 0x56f   :  { %1992 = vmatpush3.bf16.msra.mxu1 %v1989_v42 }
 0x571   :  { %2162 = vrot.lane.b32.xlu0 %v2156_v41, %s2214_s29 }
 0x5df   :  { %v2158_v44 = vpop.permute.xlu1 %2157  ;;  %v2153_v45 = vpop.permute.xlu0 %2152 }
 0x5e0   :  { %v2160_v46 = vunpack.i.h.bf16 %v2158_v44  ;;  %v2159_v47 = vunpack.i.l.bf16 %v2158_v44  ;;  %v2155_v48 = vunpack.i.h.bf16 %v2153_v45  ;;  %v2154_v49 = vunpack.i.l.bf16 %v2153_v45 }
 0x5e2   :  { %v1993_v50 = vpack.c.bf16 %v2155_v48, %v2154_v49  ;;  %v1997_v54 = vpack.c.bf16 %v2160_v46, %v2159_v47  ;;  %v2217_v46 = vmov 0.0|0.0  }
 0x5e3   :  { %v2163_v53 = vpop.permute.xlu0 %2162 }
 0x5e4   :  { %v2165_v55 = vunpack.i.h.bf16 %v2163_v53  ;;  %v2164_v56 = vunpack.i.l.bf16 %v2163_v53  ;;  %1994 = vmatprep.subr.bf16.mxu1 %v1993_v50 }
 0x5e5   :  { %1996 = vmatpush3.bf16.msra.mxu1 %v1993_v50 }
 0x5e6   :  { %1998 = vmatprep.subr.bf16.mxu1 %v1997_v54  ;;  %v2001_v57 = vpack.c.bf16 %v2165_v55, %v2164_v56 }
 0x5e9   :  { %2000 = vmatpush3.bf16.msra.mxu1 %v1997_v54 }
 0x5ea   :  { %2002 = vmatprep.subr.bf16.mxu1 %v2001_v57 }
 0x5ed   :  { %2004 = vmatpush3.bf16.msra.mxu1 %v2001_v57 }
 0x5ee   :  { %2006 = vmatprep.subr.bf16.mxu1 %v2005_v43 }
 0x5f1   :  { %2008 = vmatpush3.bf16.msra.mxu1 %v2005_v43 }
 0x5f2   :  { %2045 = vmatprep.subr.bf16.mxu1 %v2217_v46 }
 0x5f4   :  { %1832 = vmatmul.mubr.msk.f32.vlgmr.msra.gmra.mrb[6].mxu1 %vm265_vm2, %v2353_v27 }
 0x5f5   :  { %1872 = vmatprep.mubr.msk.f32.mxu1 %vm2218_vm4, %v2213_v1 }
 0x6c7   :  { %v1833_v11 = vpop.f32.mrb[6].mxu1 }
 0x6c8   :  { %v907_v12 = vadd.f32 %v1833_v11, %v1595_v10  ;;  %v891_v13 = vpop.f32.mrb[7].mxu1  ;;  %v2053_v11 = vpack.c.bf16 %v1364_v7, %v1363_v6 }
 0x6c9   :  { %v906_v15 = vadd.f32 %v1595_v10, %v891_v13  ;;  %v1289_v10 = vld [vmem:[%s2736_s3] sm:$0x3]  ;;  %v1365_v13 = vld [vmem:[%s2734_s16 + $0x10] sm:$0xff] }
 0x6ca   :  { %2205 = vtanh.f32 %v907_v12 }
 0x6cb   :  { %2207 = vtanh.f32 %v906_v15  ;;  %v1366_v15 = vld [vmem:[%s2734_s16 + $0x18] sm:$0xff] }
 0x6cc   :  { %v2057_v17 = vpack.c.bf16 %v1366_v15, %v1365_v13  ;;  %v1487_v15 = vld [vmem:[%s2737_s18 + $0x70] sm:$0xff] }
 0x6d4   :  { %v2206_v18 = vpop.eup %2205 }
 0x6d5   :  { %v2208_v20 = vpop.eup %2207 }
 0x6d6   :  { %1596 = vmatmul.mubr.msk.f32.vlgmr.msra.gmra.mrb[10].mxu0 %vm370_vm3, %v2208_v20  ;;  %v2186_v21 = vpack.i.bf16 %v2206_v18, %v2208_v20 }
 0x6d7   :  { %2020 = vmatpush3.bf16.msra.mxu0 %v2017_v9  ;;  %999 = vmatprep.mubr.f32.mxu0 %v2213_v1  ;;  %v1382_v9 = vld [vmem:[%s2734_s16 + $0x98] sm:$0xff] }
 0x6d8   :  { %2022 = vmatprep.subr.bf16.mxu0 %v2021_v19  ;;  %v2055_v12 = vpack.c.bf16 %v1382_v9, %v1381_v8 }
 0x6da   :  { %1597 = vmatmul.mubr.msk.f32.gmra.mrb[12].mxu0 %vm370_vm3, %v2206_v18 }
 0x6db   :  { %2024 = vmatpush3.bf16.msra.mxu0 %v2021_v19  ;;  %1842 = vmatprep.mubr.msk.f32.mxu0 %vm370_vm3, %v2208_v20  ;;  %v1367_v19 = vld [vmem:[%s2734_s16 + $0x20] sm:$0xff]  ;;  %v1368_v20 = vld [vmem:[%s2734_s16 + $0x28] sm:$0xff] }
 0x6de   :  { %1843 = vmatmul.mubr.msk.f32.vlgmr.msra.gmra.mrb[14].mxu0 %vm370_vm3, %v2206_v18 }
 0x6df   :  { %1865 = vmatprep.mubr.msk.f32.mxu0 %vm265_vm2, %v2349_v14 }
 0x7a9   :  { %v995_v22 = vpop.f32.mrb[10].mxu0 }
 0x7aa   :  { %v997_v23 = vpop.f32.mrb[11].mxu0 }
 0x7ad   :  { %v1001_v24 = vpop.f32.mrb[12].mxu0 }
 0x7ae   :  { %v1003_v25 = vpop.f32.mrb[13].mxu0  ;;  %v2171_v26 = vpack.i.bf16 %v1001_v24, %v995_v22  ;;  %v2025_v28 = vpack.c.bf16 %v1001_v24, %v995_v22  ;;  %v1386_v22 = vld [vmem:[%s2734_s16 + $0xb8] sm:$0xff] }
 0x7af   :  { %v2041_v29 = vpack.c.bf16 %v1003_v25, %v997_v23  ;;  %v2061_v23 = vpack.c.bf16 %v1368_v20, %v1367_v19  ;;  %v1369_v25 = vld [vmem:[%s2734_s16 + $0x30] sm:$0xff] }
 0x7b0   :  { %2172 = vrot.lane.b32.xlu0 %v2171_v26, %s2216_s4  ;;  %2167 = vrot.lane.b32.xlu1 %v2171_v26, %s2215_s30 }
 0x7b1   :  { %2026 = vmatprep.subr.bf16.mxu0 %v2025_v28 }
 0x7b2   :  { %2028 = vmatpush3.bf16.msra.mxu0 %v2025_v28  ;;  %v1387_v28 = vld [vmem:[%s2734_s16 + $0xc0] sm:$0xff] }
 0x7b4   :  { %2182 = vrot.lane.b32.xlu0 %v2181_v36, %s2214_s29  ;;  %2177 = vrot.lane.b32.xlu1 %v2171_v26, %s2214_s29  ;;  %v1370_v26 = vld [vmem:[%s2734_s16 + $0x38] sm:$0xff] }
 0x7b8   :  { %2187 = vrot.lane.b32.xlu1 %v2186_v21, %s2216_s4  ;;  %v1385_v21 = vld [vmem:[%s2734_s16 + $0xb0] sm:$0xff] }
 0x7b9   :  { %v2063_v24 = vpack.c.bf16 %v1386_v22, %v1385_v21 }
 0x822   :  { %v2173_v14 = vpop.permute.xlu0 %2172  ;;  %v2168_v30 = vpop.permute.xlu1 %2167 }
 0x823   :  { %v2175_v31 = vunpack.i.h.bf16 %v2173_v14  ;;  %v2174_v32 = vunpack.i.l.bf16 %v2173_v14  ;;  %v2170_v34 = vunpack.i.h.bf16 %v2168_v30  ;;  %v2169_v37 = vunpack.i.l.bf16 %v2168_v30 }
 0x824   :  { %v2065_v14 = vpack.c.bf16 %v1370_v26, %v1369_v25 }
 0x825   :  { %v2029_v38 = vpack.c.bf16 %v2170_v34, %v2169_v37  ;;  %v2033_v40 = vpack.c.bf16 %v2175_v31, %v2174_v32  ;;  %v1371_v31 = vld [vmem:[%s2734_s16 + $0x40] sm:$0xff]  ;;  %v1372_v32 = vld [vmem:[%s2734_s16 + $0x48] sm:$0xff]  ;;  %v1389_v34 = vld [vmem:[%s2734_s16 + $0xd0] sm:$0xff] }
 0x826   :  { %v2178_v39 = vpop.permute.xlu1 %2177  ;;  %v2183_v49 = vpop.permute.xlu0 %2182  ;;  %v1390_v37 = vld [vmem:[%s2734_s16 + $0xd8] sm:$0xff] }
 0x827   :  { %v2180_v41 = vunpack.i.h.bf16 %v2178_v39  ;;  %v2179_v42 = vunpack.i.l.bf16 %v2178_v39  ;;  %2030 = vmatprep.subr.bf16.mxu0 %v2029_v38  ;;  %v2185_v53 = vunpack.i.h.bf16 %v2183_v49  ;;  %v2184_v54 = vunpack.i.l.bf16 %v2183_v49  ;;  %v1377_v49 = vld [vmem:[%s2734_s16 + $0x70] sm:$0xff] }
 0x828   :  { %2032 = vmatpush3.bf16.msra.mxu0 %v2029_v38  ;;  %v2069_v38 = vpack.c.bf16 %v1372_v32, %v1371_v31  ;;  %v2071_v39 = vpack.c.bf16 %v1390_v37, %v1389_v34 }
 0x829   :  { %2034 = vmatprep.subr.bf16.mxu0 %v2033_v40  ;;  %v2037_v33 = vpack.c.bf16 %v2180_v41, %v2179_v42  ;;  %v1207_v58 = vsel %vm370_vm3, %v2402_v52, %v2185_v53  ;;  %v1206_v59 = vsel %vm370_vm3, %v2397_v51, %v2184_v54  ;;  %v1214_v51 = vld [vmem:[%s2735_s2] sm:$0x3]  ;;  %v2051_v52 = vpack.c.bf16 %v1380_v5, %v1379_v4  ;;  %v1374_v41 = vld [vmem:[%s2734_s16 + $0x58] sm:$0xff]  ;;  %v1482_v4 = vld [vmem:[%s2737_s18 + $0x48] sm:$0xff] }
 0x82a   :  { %v2188_v50 = vpop.permute.xlu1 %2187  ;;  %v1391_v42 = vld [vmem:[%s2734_s16 + $0xe0] sm:$0xff] }
 0x82b   :  { %v2190_v55 = vunpack.i.h.bf16 %v2188_v50  ;;  %v2189_v56 = vunpack.i.l.bf16 %v2188_v50  ;;  %v1378_v50 = vld [vmem:[%s2734_s16 + $0x78] sm:$0xff]  ;;  %v1473_v54 = vld [vmem:[%s2737_s18] sm:$0xff] }
 0x82c   :  { %2036 = vmatpush3.bf16.msra.mxu0 %v2033_v40  ;;  %v1373_v40 = vld [vmem:[%s2734_s16 + $0x50] sm:$0xff]  ;;  %v2081_v53 = vpack.c.bf16 %v1378_v50, %v1377_v49 }
 0x82d   :  { %2038 = vmatprep.subr.bf16.mxu0 %v2037_v33  ;;  %v1210_v62 = vsel %vm1208_vm5, %v1207_v58, %v2190_v55  ;;  %v1209_v63 = vsel %vm1208_vm5, %v1206_v59, %v2189_v56  ;;  %v1474_v55 = vld [vmem:[%s2737_s18 + $0x8] sm:$0xff]  ;;  %v1475_v56 = vld [vmem:[%s2737_s18 + $0x10] sm:$0xff]  ;;  %v1476_v58 = vld [vmem:[%s2737_s18 + $0x18] sm:$0xff] }
 0x82e   :  { %v2087_v59 = vpack.c.bf16 %v1476_v58, %v1475_v56 }
 0x830   :  { %2040 = vmatpush3.bf16.msra.mxu0 %v2037_v33  ;;  %v1392_v33 = vld [vmem:[%s2734_s16 + $0xe8] sm:$0xff] }
 0x831   :  { %2042 = vmatprep.subr.bf16.mxu0 %v2041_v29 }
 0x834   :  { %2044 = vmatpush3.bf16.msra.mxu0 %v2041_v29  ;;  %v1388_v29 = vld [vmem:[%s2734_s16 + $0xc8] sm:$0xff] }
 0x835   :  { %2083 = vmatprep.subr.bf16.mxu0 %v2217_v46  ;;  %v2067_v30 = vpack.c.bf16 %v1388_v29, %v1387_v28 }
 0x837   :  { %1866 = vmatmul.mubr.msk.f32.vlgmr.msra.gmra.mrb[14].mxu0 %vm265_vm2, %v2353_v27 }
 0x838   :  { %1914 = vmatprep.mubr.msk.f32.mxu0 %vm2218_vm4, %v2213_v1 }
 0x90a   :  { %v1867_v36 = vpop.f32.mrb[14].mxu0 }
 0x90b   :  { %v1183_v43 = vadd.f32 %v1867_v36, %v1602_v35  ;;  %v1167_v44 = vpop.f32.mrb[15].mxu0  ;;  %v2075_v36 = vpack.c.bf16 %v1392_v33, %v1391_v42 }
 0x90c   :  { %v1182_v45 = vadd.f32 %v1602_v35, %v1167_v44  ;;  %v2073_v35 = vpack.c.bf16 %v1374_v41, %v1373_v40  ;;  %v1376_v44 = vld [vmem:[%s2734_s16 + $0x68] sm:$0xff] }
 0x90d   :  { %2209 = vtanh.f32 %v1183_v43  ;;  %v1375_v43 = vld [vmem:[%s2734_s16 + $0x60] sm:$0xff] }
 0x90e   :  { %2211 = vtanh.f32 %v1182_v45  ;;  %v2077_v45 = vpack.c.bf16 %v1376_v44, %v1375_v43 }
 0x917   :  { %v2210_v27 = vpop.eup %2209 }
 0x918   :  { %v2212_v47 = vpop.eup %2211 }
 0x919   :  { %v2191_v48 = vpack.i.bf16 %v2210_v27, %v2212_v47  ;;  %v1393_v27 = vld [vmem:[%s2734_s16 + $0xf0] sm:$0xff]  ;;  %v1394_v47 = vld [vmem:[%s2734_s16 + $0xf8] sm:$0xff] }
 0x91b   :  { %2192 = vrot.lane.b32.xlu0 %v2191_v48, %s2215_s30  ;;  %v2079_v48 = vpack.c.bf16 %v1394_v47, %v1393_v27 }
 0x98d   :  { %v2193_v57 = vpop.permute.xlu0 %2192 }
 0x98e   :  { %v2195_v60 = vunpack.i.h.bf16 %v2193_v57  ;;  %v2194_v61 = vunpack.i.l.bf16 %v2193_v57  ;;  %v2084_v57 = vpack.c.bf16 %v1474_v55, %v1473_v54 }
 0x990   :  { %v1213_v0 = vsel %vm1211_vm6, %v1210_v62, %v2195_v60  ;;  %v1212_v2 = vsel %vm1211_vm6, %v1209_v63, %v2194_v61  ;;  %2085 = vmatpush3.bf16.msra.mxu0 %v2084_v57  ;;  %v1477_v60 = vld [vmem:[%s2737_s18 + $0x20] sm:$0xff]  ;;  %v1478_v61 = vld [vmem:[%s2737_s18 + $0x28] sm:$0xff]  ;;  %v1479_v63 = vld [vmem:[%s2737_s18 + $0x30] sm:$0xff] }
 0x991   :  { %v2046_v3 = vpack.c.bf16 %v1213_v0, %v1212_v2  ;;  %2086 = vmatprep.subr.bf16.mxu0 %v2217_v46  ;;  %v2090_v62 = vpack.c.bf16 %v1478_v61, %v1477_v60  ;;  %v1480_v0 = vld [vmem:[%s2737_s18 + $0x38] sm:$0xff] }
 0x992   :  { %v2093_v2 = vpack.c.bf16 %v1480_v0, %v1479_v63 }
 0x993   :  { %2047 = vmatpush3.bf16.msra.mxu1 %v2046_v3 }
 0x994   :  { %2048 = vmatprep.subr.bf16.mxu1 %v2217_v46  ;;  %2088 = vmatpush3.bf16.msra.mxu0 %v2087_v59 }
 0x995   :  { %2089 = vmatprep.subr.bf16.mxu0 %v2217_v46 }
 0x996   :  { %1873 = vmatmul.mubr.msk.f32.vlgmr.msra.gmra.mrb[8].mxu1 %vm1215_vm7, %v1214_v51  ;;  %v1483_v51 = vld [vmem:[%s2737_s18 + $0x50] sm:$0xff] }
 0x997   :  { %2050 = vmatpush3.bf16.msra.mxu1 %v2046_v3  ;;  %1879 = vmatprep.mubr.msk.f32.mxu1 %vm2218_vm4, %v2213_v1  ;;  %v1384_v1 = vld [vmem:[%s2734_s16 + $0xa8] sm:$0xff]  ;;  %v1481_v3 = vld [vmem:[%s2737_s18 + $0x40] sm:$0xff] }
 0x998   :  { %2052 = vmatprep.subr.bf16.mxu1 %v2051_v52  ;;  %v2059_v18 = vpack.c.bf16 %v1384_v1, %v1383_v16  ;;  %2091 = vmatpush3.bf16.msra.mxu0 %v2090_v62  ;;  %v2096_v5 = vpack.c.bf16 %v1482_v4, %v1481_v3  ;;  %v1484_v52 = vld [vmem:[%s2737_s18 + $0x58] sm:$0xff] }
 0x999   :  { %2092 = vmatprep.subr.bf16.mxu0 %v2217_v46  ;;  %v2099_v6 = vpack.c.bf16 %v1484_v52, %v1483_v51  ;;  %v1488_v16 = vld [vmem:[%s2737_s18 + $0x78] sm:$0xff] }
 0x99a   :  { %1880 = vmatmul.mubr.msk.f32.vlgmr.msra.gmra.mrb[10].mxu1 %vm1215_vm7, %v1289_v10  ;;  %v2105_v1 = vpack.c.bf16 %v1488_v16, %v1487_v15 }
 0x99b   :  { %2054 = vmatpush3.bf16.msra.mxu1 %v2053_v11  ;;  %v1485_v11 = vld [vmem:[%s2737_s18 + $0x60] sm:$0xff] }
 0x99c   :  { %2056 = vmatprep.subr.bf16.mxu1 %v2055_v12  ;;  %2094 = vmatpush3.bf16.msra.mxu0 %v2093_v2  ;;  %v1486_v12 = vld [vmem:[%s2737_s18 + $0x68] sm:$0xff] }
 0x99d   :  { %2095 = vmatprep.subr.bf16.mxu0 %v2217_v46  ;;  %v2102_v13 = vpack.c.bf16 %v1486_v12, %v1485_v11 }
 0x99f   :  { %2058 = vmatpush3.bf16.msra.mxu1 %v2057_v17  ;;  %v25_v17 = vstv %s2738_s19 }
 0x9a0   :  { %2060 = vmatprep.subr.bf16.mxu1 %v2059_v18  ;;  %2097 = vmatpush3.bf16.msra.mxu0 %v2096_v5  ;;  %26 = vst [vmem:[#allocation2] sm:$0x1] %v25_v17 }
 0x9a1   :  { %2098 = vmatprep.subr.bf16.mxu0 %v2217_v46 }
 0x9a3   :  { %2062 = vmatpush3.bf16.msra.mxu1 %v2061_v23 }
 0x9a4   :  { %2064 = vmatprep.subr.bf16.mxu1 %v2063_v24  ;;  %2100 = vmatpush3.bf16.msra.mxu0 %v2099_v6 }
 0x9a5   :  { %2101 = vmatprep.subr.bf16.mxu0 %v2217_v46 }
 0x9a7   :  { %2066 = vmatpush3.bf16.msra.mxu1 %v2065_v14  ;;  %v1606_v23 = vld [vmem:[#allocation2] ss:$0 sm:$0xff] }
 0x9a8   :  { %2068 = vmatprep.subr.bf16.mxu1 %v2067_v30  ;;  %2103 = vmatpush3.bf16.msra.mxu0 %v2102_v13 }
 0x9a9   :  { %2104 = vmatprep.subr.bf16.mxu0 %v2217_v46  ;;  %v1605_v46 = vld [vmem:[%s2739_s17] ss:$0 sm:$0xff] }
 0x9ab   :  { %2070 = vmatpush3.bf16.msra.mxu1 %v2069_v38 }
 0x9ac   :  { %2072 = vmatprep.subr.bf16.mxu1 %v2071_v39  ;;  %2106 = vmatpush3.bf16.msra.mxu0 %v2105_v1 }
 0x9af   :  { %2074 = vmatpush3.bf16.msra.mxu1 %v2073_v35 }
 0x9b0   :  { %2076 = vmatprep.subr.bf16.mxu1 %v2075_v36 }
 0x9b3   :  { %2078 = vmatpush3.bf16.msra.mxu1 %v2077_v45 }
 0x9b4   :  { %2080 = vmatprep.subr.bf16.mxu1 %v2079_v48 }
 0x9b7   :  { %2082 = vmatpush3.bf16.msra.mxu1 %v2081_v53 }
 0xa69   :  { %v1285_v7 = vpop.f32.mrb[8].mxu1 }
 0xa6a   :  { %v1874_v8 = vpop.f32.mrb[9].mxu1 }
 0xa6d   :  { %v1359_v9 = vpop.f32.mrb[10].mxu1 }
 0xa6e   :  { %v1881_v10 = vpop.f32.mrb[11].mxu1  ;;  %1466 = vmatprep.mubr.f32.mxu1 %v1359_v9 }
 0xa6f   :  { %1467 = vmatmul.mubr.f32.vlgmr.msra.gmra.mrb[12].mxu1 %v1285_v7 }
 0xb42   :  { %v1718_v18 = vpop.f32.mrb[12].mxu1 }
 0xb43   :  { %v1719_v19 = vpop.f32.mrb[13].mxu1 }
 0xb44   :  { %v1720_v20 = vadd.f32 %v1719_v19, %v1718_v18 }
 0xb46   :  { %v1469_v21 = vadd.f32 %v1720_v20, %v1605_v46 }
 0xb48   :  { %v1472_v22 = vmax.f32 %v1469_v21, 0.0 }
 0xb4a   :  { %1915 = vmatmul.mubr.f32.vlgmr.msra.gmra.mrb[16].mxu0 %v1472_v22 }
 0xc1d   :  { %v1562_v24 = vpop.f32.mrb[16].mxu0 }
 0xc1e   :  { %v1563_v25 = vadd.f32 %v1606_v23, %v1562_v24  ;;  %v1916_v26 = vpop.f32.mrb[17].mxu0 }
 0xc20   :  { %1567 = vst.msk [vmem:[%s2740_s20] sm:$0x3] %vm1566_vm8, %v1563_v25 }

</bundles_post_ra>
